<compile_context>
chip_gen: v6e
topology: v6e:2x2x1
jax: 0.10.0
libtpu: 0.0.40
codegen_flags: <defaults>
</compile_context>

<pallas_src>
import functools

import jax
import jax.numpy as jnp
from jax.experimental import pallas as pl
from jax.experimental.pallas import tpu as pltpu

NEG_SLOPE = 0.01  # PyTorch nn.LeakyReLU default
H1 = 256          # first hidden width (already lane aligned)
H2 = 64           # second hidden width (lane-padded to 128 for the intermediate)
LANES = 128


def _round_up(x, m):
    return (x + m - 1) // m * m


def _cdiv(a, b):
    return -(-a // b)


def _leaky_relu(x):
    # max(x, a*x) == LeakyReLU for 0 < a < 1 (2 VALU ops vs 3 for cmp+mul+select).
    return jnp.maximum(x, NEG_SLOPE * x)


def dqn_kernel(x_ref, w1_ref, b1_ref, w2_ref, b2_ref, w3_ref, b3_ref, o_ref):
    # One (TB, num_inputs) activation tile against VMEM-resident bf16 weights.
    x = x_ref[...].astype(jnp.bfloat16)

    h1 = jnp.dot(x, w1_ref[...], preferred_element_type=jnp.float32) + b1_ref[...]
    h1 = _leaky_relu(h1)

    h2 = jnp.dot(h1.astype(jnp.bfloat16), w2_ref[...],
                 preferred_element_type=jnp.float32) + b2_ref[...]
    h2 = _leaky_relu(h2)

    h3 = jnp.dot(h2.astype(jnp.bfloat16), w3_ref[...],
                 preferred_element_type=jnp.float32) + b3_ref[...]
    o_ref[...] = _leaky_relu(h3)  # module applies LeakyReLU on the last layer too


def prepare_params(params):
    """One-time param prep (run once, outside the forward path):
    bf16 weights, and the 64-wide hidden lane-padded to 128 with exact zeros.
    Weights are stored (in, out); biases are (1, out)."""
    h2p = _round_up(H2, LANES)  # 64 -> 128
    num_actions = params["w3"].shape[1]
    w2p = jnp.zeros((H1, h2p), jnp.bfloat16).at[:, :H2].set(
        params["w2"].astype(jnp.bfloat16))
    b2p = jnp.zeros((1, h2p), jnp.float32).at[:, :H2].set(
        params["b2"].astype(jnp.float32))
    w3p = jnp.zeros((h2p, num_actions), jnp.bfloat16).at[:H2, :].set(
        params["w3"].astype(jnp.bfloat16))
    return {
        "w1": params["w1"].astype(jnp.bfloat16),
        "b1": params["b1"].astype(jnp.float32),
        "w2": w2p, "b2": b2p,
        "w3": w3p, "b3": params["b3"].astype(jnp.float32),
    }


def _pick_tb(batch, block_b):
    """Static batch-tile size: few big steps; >=2 steps when possible so v7x's
    two TensorCores both get work; minimum 8 sublanes."""
    if batch <= 8:
        return 8
    if batch <= 2 * block_b:
        return _round_up(_cdiv(batch, 2), 8)
    return block_b


def _vmem_limit_bytes(tb, num_inputs, h2p, num_actions):
    """Conservative scoped-VMEM estimate (double-buffered streamed tiles,
    f32+bf16 intermediates, double-buffered resident weights) with margin."""
    stream = 2 * tb * (num_inputs + num_actions) * 4
    inter = tb * (H1 + h2p) * 6
    weights = 2 * ((num_inputs * H1 + H1 * h2p + h2p * num_actions) * 2
                   + (H1 + h2p + num_actions) * 4)
    est = stream + inter + weights
    return int(max(16 << 20, min(int(1.5 * est) + (4 << 20), 48 << 20)))


@functools.partial(jax.jit, static_argnames=("block_b",))
def simple_dqn_forward(x, prepped, *, block_b=1024):
    """x: (B, num_inputs) f32 (or bf16). prepped: output of prepare_params."""
    w1, b1, w2, b2, w3, b3 = (prepped["w1"], prepped["b1"], prepped["w2"],
                              prepped["b2"], prepped["w3"], prepped["b3"])
    B, num_inputs = x.shape
    h2p = w2.shape[1]
    num_actions = w3.shape[1]

    tb = _pick_tb(B, block_b)
    grid = (_cdiv(B, tb),)  # ragged final block handled by Pallas (no x padding)

    out = pl.pallas_call(
        dqn_kernel,
        out_shape=jax.ShapeDtypeStruct((B, num_actions), jnp.float32),
        grid=grid,
        in_specs=[
            # streamed activation tile (double-buffered by the pipeline)
            pl.BlockSpec((tb, num_inputs), lambda i: (i, 0)),
            # VMEM-resident weights / biases (constant index_map -> DMA'd once)
            pl.BlockSpec((num_inputs, H1), lambda i: (0, 0)),
            pl.BlockSpec((1, H1), lambda i: (0, 0)),
            pl.BlockSpec((H1, h2p), lambda i: (0, 0)),
            pl.BlockSpec((1, h2p), lambda i: (0, 0)),
            pl.BlockSpec((h2p, num_actions), lambda i: (0, 0)),
            pl.BlockSpec((1, num_actions), lambda i: (0, 0)),
        ],
        # Unpadded output: last dim == full array dim (legal), tiny writeback.
        out_specs=pl.BlockSpec((tb, num_actions), lambda i: (i, 0)),
        compiler_params=pltpu.CompilerParams(
            dimension_semantics=("parallel",),  # v7x: 2 TCs split the batch tiles
            vmem_limit_bytes=_vmem_limit_bytes(tb, num_inputs, h2p, num_actions),
        ),
    )(x, w1, b1, w2, b2, w3, b3)

    return out


def init_params(key, num_inputs, num_actions):
    """Deterministic init (uniform, PyTorch-Linear-style bounds), weights (in, out)."""
    dims = [(num_inputs, H1), (H1, H2), (H2, num_actions)]
    params = {}
    keys = jax.random.split(key, 2 * len(dims))
    for i, (fan_in, fan_out) in enumerate(dims):
        bound = 1.0 / (fan_in ** 0.5)
        params[f"w{i + 1}"] = jax.random.uniform(
            keys[2 * i], (fan_in, fan_out), jnp.float32, -bound, bound)
        params[f"b{i + 1}"] = jax.random.uniform(
            keys[2 * i + 1], (1, fan_out), jnp.float32, -bound, bound)
    return params


if __name__ == "__main__":
    key = jax.random.PRNGKey(0)
    k_x, k_x2, k_p = jax.random.split(key, 3)

    num_inputs = 8
    num_actions = 4

    params = init_params(k_p, num_inputs, num_actions)
    prepped = prepare_params(params)

    # Plain-JAX reference with the same numerics (bf16 matmul operands,
    # f32 accumulation, f32 bias + LeakyReLU).
    def ref(x, p):
        def layer(h, w, b):
            y = jnp.dot(h.astype(jnp.bfloat16), w.astype(jnp.bfloat16),
                        preferred_element_type=jnp.float32) + b
            return jnp.where(y > 0, y, NEG_SLOPE * y)
        h = layer(x, p["w1"], p["b1"])
        h = layer(h, p["w2"], p["b2"])
        return layer(h, p["w3"], p["b3"])

    # Small batch (single grid step, partial batch tile).
    batch = 2
    x = jax.random.normal(k_x, (batch, num_inputs), dtype=jnp.float32)
    out = simple_dqn_forward(x, prepped)
    jax.block_until_ready(out)
    expected = ref(x, params)
    assert out.shape == (batch, num_actions)
    assert jnp.allclose(out, expected, atol=1e-3, rtol=1e-3), (
        float(jnp.max(jnp.abs(out - expected))))

    # Larger batch (2 grid steps, ragged final tile) to exercise the pipeline.
    batch2 = 100
    x2 = jax.random.normal(k_x2, (batch2, num_inputs), dtype=jnp.float32)
    out2 = simple_dqn_forward(x2, prepped)
    jax.block_until_ready(out2)
    expected2 = ref(x2, params)
    assert out2.shape == (batch2, num_actions)
    assert jnp.allclose(out2, expected2, atol=1e-3, rtol=1e-3), (
        float(jnp.max(jnp.abs(out2 - expected2))))

    print("KERNEL_OK")
</pallas_src>

<mosaic_0001>
module attributes {stable_mosaic.version = 11 : i64} {
  func.func @dqn_kernel(%arg0: i32, %arg1: memref<8x8xf32, #tpu.memory_space<vmem>>, %arg2: memref<8x256xbf16, #tpu.memory_space<vmem>>, %arg3: memref<1x256xf32, #tpu.memory_space<vmem>>, %arg4: memref<256x128xbf16, #tpu.memory_space<vmem>>, %arg5: memref<1x128xf32, #tpu.memory_space<vmem>>, %arg6: memref<128x4xbf16, #tpu.memory_space<vmem>>, %arg7: memref<1x4xf32, #tpu.memory_space<vmem>>, %arg8: memref<8x4xf32, #tpu.memory_space<vmem>>) attributes {dimension_semantics = [#tpu.dimension_semantics<parallel>], iteration_bounds = array<i64: 1>, scalar_prefetch = 0 : i64, scratch_operands = 0 : i64, tpu.core_type = #tpu.core_type<tc>, window_params = [{transform_indices = @transform_0, window_bounds = array<i64: 8, 8>}, {pipeline_mode = #tpu.pipeline_mode<synchronous>, transform_indices = @transform_1, window_bounds = array<i64: 8, 256>}, {pipeline_mode = #tpu.pipeline_mode<synchronous>, transform_indices = @transform_2, window_bounds = array<i64: 1, 256>}, {pipeline_mode = #tpu.pipeline_mode<synchronous>, transform_indices = @transform_3, window_bounds = array<i64: 256, 128>}, {pipeline_mode = #tpu.pipeline_mode<synchronous>, transform_indices = @transform_4, window_bounds = array<i64: 1, 128>}, {pipeline_mode = #tpu.pipeline_mode<synchronous>, transform_indices = @transform_5, window_bounds = array<i64: 128, 4>}, {pipeline_mode = #tpu.pipeline_mode<synchronous>, transform_indices = @transform_6, window_bounds = array<i64: 1, 4>}, {transform_indices = @transform_7, window_bounds = array<i64: 8, 4>}]} {
    %c0 = arith.constant 0 : index
    %c0_0 = arith.constant 0 : index
    %0 = vector.load %arg1[%c0, %c0_0] : memref<8x8xf32, #tpu.memory_space<vmem>>, vector<8x8xf32>
    %1 = arith.truncf %0 : vector<8x8xf32> to vector<8x8xbf16>
    %c0_1 = arith.constant 0 : index
    %c0_2 = arith.constant 0 : index
    %2 = vector.load %arg2[%c0_1, %c0_2] : memref<8x256xbf16, #tpu.memory_space<vmem>>, vector<8x256xbf16>
    %cst = arith.constant dense<0.000000e+00> : vector<8x256xf32>
    %3 = tpu.matmul %1, %2, %cst {dimension_numbers = #tpu.dot_dimension_numbers<[1], [0], [0], [1], [0, 0, 1, 1], [], []>} : vector<8x8xbf16>, vector<8x256xbf16>, vector<8x256xf32> -> vector<8x256xf32>
    %c0_3 = arith.constant 0 : index
    %c0_4 = arith.constant 0 : index
    %4 = vector.load %arg3[%c0_3, %c0_4] : memref<1x256xf32, #tpu.memory_space<vmem>>, vector<1x256xf32>
    %5 = vector.broadcast %4 : vector<1x256xf32> to vector<8x256xf32>
    %6 = arith.addf %3, %5 : vector<8x256xf32>
    %cst_5 = arith.constant 0.00999999977 : f32
    %7 = vector.broadcast %cst_5 : f32 to vector<8x256xf32>
    %8 = arith.mulf %7, %6 : vector<8x256xf32>
    %9 = arith.maximumf %6, %8 : vector<8x256xf32>
    %10 = arith.truncf %9 : vector<8x256xf32> to vector<8x256xbf16>
    %c0_6 = arith.constant 0 : index
    %c0_7 = arith.constant 0 : index
    %11 = vector.load %arg4[%c0_6, %c0_7] : memref<256x128xbf16, #tpu.memory_space<vmem>>, vector<256x128xbf16>
    %cst_8 = arith.constant dense<0.000000e+00> : vector<8x128xf32>
    %12 = tpu.matmul %10, %11, %cst_8 {dimension_numbers = #tpu.dot_dimension_numbers<[1], [0], [0], [1], [0, 0, 1, 1], [], []>} : vector<8x256xbf16>, vector<256x128xbf16>, vector<8x128xf32> -> vector<8x128xf32>
    %c0_9 = arith.constant 0 : index
    %c0_10 = arith.constant 0 : index
    %13 = vector.load %arg5[%c0_9, %c0_10] : memref<1x128xf32, #tpu.memory_space<vmem>>, vector<1x128xf32>
    %14 = vector.broadcast %13 : vector<1x128xf32> to vector<8x128xf32>
    %15 = arith.addf %12, %14 : vector<8x128xf32>
    %cst_11 = arith.constant 0.00999999977 : f32
    %16 = vector.broadcast %cst_11 : f32 to vector<8x128xf32>
    %17 = arith.mulf %16, %15 : vector<8x128xf32>
    %18 = arith.maximumf %15, %17 : vector<8x128xf32>
    %19 = arith.truncf %18 : vector<8x128xf32> to vector<8x128xbf16>
    %c0_12 = arith.constant 0 : index
    %c0_13 = arith.constant 0 : index
    %20 = vector.load %arg6[%c0_12, %c0_13] : memref<128x4xbf16, #tpu.memory_space<vmem>>, vector<128x4xbf16>
    %cst_14 = arith.constant dense<0.000000e+00> : vector<8x4xf32>
    %21 = tpu.matmul %19, %20, %cst_14 {dimension_numbers = #tpu.dot_dimension_numbers<[1], [0], [0], [1], [0, 0, 1, 1], [], []>} : vector<8x128xbf16>, vector<128x4xbf16>, vector<8x4xf32> -> vector<8x4xf32>
    %c0_15 = arith.constant 0 : index
    %c0_16 = arith.constant 0 : index
    %22 = vector.load %arg7[%c0_15, %c0_16] : memref<1x4xf32, #tpu.memory_space<vmem>>, vector<1x4xf32>
    %23 = vector.broadcast %22 : vector<1x4xf32> to vector<8x4xf32>
    %24 = arith.addf %21, %23 : vector<8x4xf32>
    %cst_17 = arith.constant 0.00999999977 : f32
    %25 = vector.broadcast %cst_17 : f32 to vector<8x4xf32>
    %26 = arith.mulf %25, %24 : vector<8x4xf32>
    %27 = arith.maximumf %24, %26 : vector<8x4xf32>
    %c0_18 = arith.constant 0 : index
    %c0_19 = arith.constant 0 : index
    %28 = vector.load %arg8[%c0_18, %c0_19] : memref<8x4xf32, #tpu.memory_space<vmem>>, vector<8x4xf32>
    tpu.vector_store %arg8[%c0_18, %c0_19], %27 {strides = array<i32>} : memref<8x4xf32, #tpu.memory_space<vmem>>, vector<8x4xf32>,
    return
  }
  func.func @transform_0(%arg0: i32) -> (i32, i32) {
    %c0_i32 = arith.constant 0 : i32
    %c0_i32_0 = arith.constant 0 : i32
    return %arg0, %c0_i32 : i32, i32
  }
  func.func @transform_1(%arg0: i32) -> (i32, i32) {
    %c0_i32 = arith.constant 0 : i32
    %c0_i32_0 = arith.constant 0 : i32
    %c0_i32_1 = arith.constant 0 : i32
    return %c0_i32, %c0_i32_0 : i32, i32
  }
  func.func @transform_2(%arg0: i32) -> (i32, i32) {
    %c0_i32 = arith.constant 0 : i32
    %c0_i32_0 = arith.constant 0 : i32
    %c0_i32_1 = arith.constant 0 : i32
    return %c0_i32, %c0_i32_0 : i32, i32
  }
  func.func @transform_3(%arg0: i32) -> (i32, i32) {
    %c0_i32 = arith.constant 0 : i32
    %c0_i32_0 = arith.constant 0 : i32
    %c0_i32_1 = arith.constant 0 : i32
    return %c0_i32, %c0_i32_0 : i32, i32
  }
  func.func @transform_4(%arg0: i32) -> (i32, i32) {
    %c0_i32 = arith.constant 0 : i32
    %c0_i32_0 = arith.constant 0 : i32
    %c0_i32_1 = arith.constant 0 : i32
    return %c0_i32, %c0_i32_0 : i32, i32
  }
  func.func @transform_5(%arg0: i32) -> (i32, i32) {
    %c0_i32 = arith.constant 0 : i32
    %c0_i32_0 = arith.constant 0 : i32
    %c0_i32_1 = arith.constant 0 : i32
    return %c0_i32, %c0_i32_0 : i32, i32
  }
  func.func @transform_6(%arg0: i32) -> (i32, i32) {
    %c0_i32 = arith.constant 0 : i32
    %c0_i32_0 = arith.constant 0 : i32
    %c0_i32_1 = arith.constant 0 : i32
    return %c0_i32, %c0_i32_0 : i32, i32
  }
  func.func @transform_7(%arg0: i32) -> (i32, i32) {
    %c0_i32 = arith.constant 0 : i32
    %c0_i32_0 = arith.constant 0 : i32
    return %arg0, %c0_i32 : i32, i32
  }
}

</mosaic_0001>

<bundles_post_ra>
// kernel: simple_dqn_forward.1
= control target key start
LH: loop header
LB: loop body
LE: loop exit
PB: predicated region body
PF: predicated region fallthrough
CT: control target
= control target key end

     0   :  { %12 = vsyncpa [#allocation3], 0  ;;  %s684_s0 = inlined_call_operand.vmem [shape: f32[2,8], index: 0, kind: input, shape index: {}]   ;;  %s685_s1 = inlined_call_operand.vmem [shape: bf16[8,256], index: 1, kind: input, shape index: {}]   ;;  %s686_s2 = inlined_call_operand.vmem [shape: f32[1,256], index: 2, kind: input, shape index: {}]   ;;  %s687_s3 = inlined_call_operand.hbm [shape: bf16[256,128], index: 3, kind: input, shape index: {}]   ;;  %s688_s4 = inlined_call_operand.vmem [shape: f32[1,128], index: 4, kind: input, shape index: {}]   ;;  %s689_s5 = inlined_call_operand.vmem [shape: bf16[128,4], index: 5, kind: input, shape index: {}]   ;;  %s690_s6 = inlined_call_operand.vmem [shape: f32[1,4], index: 6, kind: input, shape index: {}]   ;;  %s691_s7 = inlined_call_operand.hbm [shape: f32[2,4], index: 7, kind: output, shape index: {}]  }
   0x1   :  { %13 = vsyncpa [#allocation4], 0  ;;  %s590_s24 = smov [#allocation2]  }
   0x2   :  { %s25_s25 = sshll.u32 %s590_s24, 4  ;;  %s26_s25 = int_to_ptr.vmem [resolvable:$true] %s25_s25 }
   0x3   :  { %s554_s26 = scalar_lea.vmem %s26_s25, 2048  ;;  %p559_p1 = scmp.lt.s32.totalorder %s26_s25, %s26_s25 }
   0x4   :  { %p555_p0 = scmp.ne.s32.totalorder %s26_s25, %s554_s26  ;;  %p560_p2 = scmp.lt.s32.totalorder %s554_s26, %s554_s26 }
   0x6   :  { %p561_p3 = por %p560_p2, %p559_p1 }
   0x8   :  { %p562_p4 = pnand %p561_p3, %p555_p0 }
   0xa   :  { %565 = shalt.err (!%p562_p4)
}
   0xb   :  { %s591_s27 = smov 64   ;;  %s592_s28 = smov 4  }
   0xc   :  { %31 = dma.hbm_to_vmem [thread:$0]  %s687_s3, 2048, %s26_s25, [#allocation3], %s591_s27, %s591_s27, %s592_s28  }
   0xd   :  { %586 = dma.done.wait [#allocation3], 2048  }
   0xe   :  { %587 = vsyncadd [#allocation3], 4294965248  ;;  %v593_v0 = vmov 0   ;;  %v44_v1 = vld [vmem:[%s685_s1] sm:$0xff]  ;;  %vm66_vm0 = vcmask 1043456   ;;  %v522_v5 = vld [vmem:[#allocation2 + $0x78] sm:$0xff]   ;;  %v47_v29 = vlaneseq }
   0xf   :  { %105 = vmatprep.mubr.bf16.mxu0 %v593_v0  ;;  %v42_v2 = vld [vmem:[%s684_s0] sm:$0xff]  ;;  %v431_v3 = vcombine.high %v44_v1, %v44_v1  ;;  %v430_v4 = vcombine.low %v44_v1, %v44_v1  ;;  %v523_v6 = vld [vmem:[#allocation2 + $0x38] sm:$0xff]   ;;  %460 = vmatprep.subr.bf16.mxu1 %v522_v5  ;;  %v524_v9 = vld [vmem:[#allocation2 + $0x70] sm:$0xff]   ;;  %vm62_vm1 = vcmask 64512   ;;  %v594_v24 = vmov 0.0  }
  0x10   :  { %v43_v8 = vpack.c.bf16 %v42_v2, %v42_v2  ;;  %461 = vmatpush3.bf16.msra.mxu1 %v523_v6  ;;  %v525_v10 = vld [vmem:[#allocation2 + $0x30] sm:$0xff]   ;;  %v526_v11 = vld [vmem:[#allocation2 + $0x68] sm:$0xff]   ;;  %v528_v13 = vld [vmem:[#allocation2 + $0x60] sm:$0xff]   ;;  %v48_v30 = vshrl.u32 %v47_v29, 7  ;;  %vm595_vm2 = vmmov 0   ;;  %vm411_vm3 = vcmask 31744  }
  0x11   :  { %432 = vmatprep.subr.msk.bf16.mxu0 %vm66_vm0, %v431_v3  ;;  %v68_v7 = vsel %vm66_vm0, %v430_v4, 0  ;;  %462 = vmatprep.subr.bf16.mxu1 %v524_v9  ;;  %v527_v12 = vld [vmem:[#allocation2 + $0x28] sm:$0xff]   ;;  %v529_v14 = vld [vmem:[#allocation2 + $0x20] sm:$0xff]   ;;  %v530_v15 = vld [vmem:[#allocation2 + $0x58] sm:$0xff]  }
  0x12   :  { %88 = vmatpush1.bf16.msra.mxu0 %v68_v7  ;;  %v531_v16 = vld [vmem:[#allocation2 + $0x18] sm:$0xff]   ;;  %v532_v17 = vld [vmem:[#allocation2 + $0x50] sm:$0xff]   ;;  %v534_v19 = vld [vmem:[#allocation2 + $0x48] sm:$0xff]   ;;  %v49_v31 = vsub.s32 0, %v48_v30  ;;  %v53_v33 = vsub.s32 1, %v48_v30 }
  0x13   :  { %v533_v18 = vld [vmem:[#allocation2 + $0x10] sm:$0xff]   ;;  %v535_v20 = vld [vmem:[#allocation2 + $0x8] sm:$0xff]   ;;  %v536_v21 = vld [vmem:[#allocation2 + $0x40] sm:$0xff]   ;;  %491 = vmatprep.subr.bf16.mxu0 %v594_v24 }
  0x14   :  { %463 = vmatpush3.bf16.msra.mxu1 %v525_v10  ;;  %v537_v22 = vld [vmem:[#allocation2] sm:$0xff]   ;;  %v538_v23 = vld [vmem:[%s689_s5 + $0x38] sm:$0xff]   ;;  %v539_v25 = vld [vmem:[%s689_s5 + $0x30] sm:$0xff]  }
  0x15   :  { %433 = vmatmul.mubr.msk.bf16.vlgmr.msra.gmra.mxu0 %vm62_vm1, %v43_v8  ;;  %464 = vmatprep.subr.bf16.mxu1 %v526_v11  ;;  %v540_v26 = vld [vmem:[%s689_s5 + $0x28] sm:$0xff]   ;;  %v541_v27 = vld [vmem:[%s689_s5 + $0x20] sm:$0xff]   ;;  %v542_v28 = vld [vmem:[%s689_s5 + $0x18] sm:$0xff]  }
  0x16   :  { %492 = vmatpush3.bf16.msra.mxu0 %v538_v23  ;;  %v45_v32 = vld [vmem:[%s686_s2] sm:$0x3]  ;;  %v543_v48 = vld [vmem:[%s689_s5 + $0x10] sm:$0xff]   ;;  %v544_v49 = vld [vmem:[%s689_s5 + $0x8] sm:$0xff]   ;;  %507 = vmatprep.mubr.msk.bf16.mxu0 %vm595_vm2, %v594_v24 }
  0x17   :  { %493 = vmatprep.subr.bf16.mxu0 %v594_v24  ;;  %v50_v34 = vrot.slane %v45_v32, %v49_v31  ;;  %v54_v35 = vrot.slane %v45_v32, %v53_v33  ;;  %v545_v50 = vld [vmem:[%s689_s5] sm:$0xff]  }
  0x18   :  { %465 = vmatpush3.bf16.msra.mxu1 %v527_v12  ;;  %v434_v52 = vld [vmem:[%s688_s4] ss:$0 sm:$0xff] }
  0x19   :  { %466 = vmatprep.subr.bf16.mxu1 %v528_v13  ;;  %v451_v61 = vld [vmem:[%s690_s6] ss:$0 sm:$0xff] }
  0x1a   :  { %494 = vmatpush3.bf16.msra.mxu0 %v539_v25 }
  0x1b   :  { %495 = vmatprep.subr.bf16.mxu0 %v594_v24 }
  0x1c   :  { %467 = vmatpush3.bf16.msra.mxu1 %v529_v14 }
  0x1d   :  { %468 = vmatprep.subr.bf16.mxu1 %v530_v15 }
  0x1e   :  { %496 = vmatpush3.bf16.msra.mxu0 %v540_v26 }
  0x1f   :  { %497 = vmatprep.subr.bf16.mxu0 %v594_v24 }
  0x20   :  { %469 = vmatpush3.bf16.msra.mxu1 %v531_v16 }
  0x21   :  { %470 = vmatprep.subr.bf16.mxu1 %v532_v17 }
  0x22   :  { %498 = vmatpush3.bf16.msra.mxu0 %v541_v27 }
  0x23   :  { %499 = vmatprep.subr.bf16.mxu0 %v594_v24 }
  0x24   :  { %471 = vmatpush3.bf16.msra.mxu1 %v533_v18 }
  0x25   :  { %472 = vmatprep.subr.bf16.mxu1 %v534_v19 }
  0x26   :  { %500 = vmatpush3.bf16.msra.mxu0 %v542_v28 }
  0x27   :  { %501 = vmatprep.subr.bf16.mxu0 %v594_v24 }
  0x28   :  { %473 = vmatpush3.bf16.msra.mxu1 %v535_v20 }
  0x29   :  { %474 = vmatprep.subr.bf16.mxu1 %v536_v21 }
  0x2a   :  { %502 = vmatpush3.bf16.msra.mxu0 %v543_v48 }
  0x2b   :  { %503 = vmatprep.subr.bf16.mxu0 %v594_v24 }
  0x2c   :  { %475 = vmatpush3.bf16.msra.mxu1 %v537_v22 }
  0x2e   :  { %504 = vmatpush3.bf16.msra.mxu0 %v544_v49 }
  0x2f   :  { %505 = vmatprep.subr.bf16.mxu0 %v594_v24 }
  0x32   :  { %506 = vmatpush3.bf16.msra.mxu0 %v545_v50 }
  0xd5   :  { %v107_v36 = vpop.f32.mrf.mxu0 }
  0xd6   :  { %v108_v37 = vadd.f32 %v107_v36, %v50_v34 }
  0xd7   :  { %v109_v38 = vpop.f32.mrf.mxu0 }
  0xd8   :  { %v114_v39 = vmul.f32 0.01, %v108_v37  ;;  %v110_v40 = vadd.f32 %v109_v38, %v54_v35 }
  0xd9   :  { %v111_v41 = vpop.f32.mrf.mxu0 }
  0xda   :  { %v115_v42 = vmul.f32 0.01, %v110_v40  ;;  %v116_v43 = vmax.f32 %v108_v37, %v114_v39 }
  0xdb   :  { %v112_v44 = vpop.f32.mrf.mxu0 }
  0xdc   :  { %v117_v45 = vmax.f32 %v110_v40, %v115_v42  ;;  %v118_v47 = vpack.c.bf16 %v116_v43, %v116_v43 }
  0xde   :  { %v119_v46 = vpack.c.bf16 %v117_v45, %v117_v45 }
  0xe0   :  { %287 = vmatprep.mubr.bf16.mxu1 %v119_v46 }
  0xe1   :  { %288 = vmatmul.mubr.bf16.vlgmr.msra.gmra.mxu1 %v118_v47 }
 0x1a1   :  { %v476_v51 = vpop.f32.mrf.mxu1 }
 0x1a3   :  { %v477_v53 = vpop.f32.mrf.mxu1 }
 0x1a4   :  { %v478_v54 = vadd.f32 %v477_v53, %v476_v51 }
 0x1a5   :  { %v479_v55 = vpop.f32.mrf.mxu1 }
 0x1a6   :  { %v290_v56 = vadd.f32 %v478_v54, %v434_v52 }
 0x1a7   :  { %v480_v57 = vpop.f32.mrf.mxu1 }
 0x1a8   :  { %v295_v58 = vmul.f32 0.01, %v290_v56 }
 0x1aa   :  { %v296_v59 = vmax.f32 %v290_v56, %v295_v58 }
 0x1ac   :  { %v297_v60 = vpack.c.bf16 %v296_v59, %v296_v59 }
 0x1ae   :  { %508 = vmatmul.mubr.bf16.vlgmr.msra.gmra.mxu0 %v297_v60 }
 0x26e   :  { %v403_v62 = vpop.f32.mrf.mxu0 }
 0x26f   :  { %v404_v63 = vadd.f32 %v451_v61, %v403_v62 }
 0x270   :  { %v509_v0 = vpop.f32.mrf.mxu0 }
 0x271   :  { %v409_v1 = vmul.f32 0.01, %v404_v63 }
 0x272   :  { %v406_v2 = vpop.f32.mrf.mxu0 }
 0x273   :  { %v410_v3 = vmax.f32 %v404_v63, %v409_v1 }
 0x274   :  { %v510_v4 = vpop.f32.mrf.mxu0 }
 0x275   :  { %412 = vst.msk [vmem:[#allocation5] sm:$0xff] %vm411_vm3, %v410_v3 }
 0x276   :  { %417 = vsyncadd [#allocation4], 96  ;;  %s596_s4 = smov [#allocation5]  }
 0x277   :  { %s418_s5 = sshll.u32 %s596_s4, 4  ;;  %s419_s5 = int_to_ptr.vmem [resolvable:$true] %s418_s5 }
 0x278   :  { %s566_s30 = scalar_lea.vmem %s419_s5, 32  ;;  %s570_s8 = scalar_lea.vmem %s419_s5, 128 }
 0x279   :  { %p567_p5 = scmp.ne.s32.totalorder %s419_s5, %s566_s30  ;;  %p571_p6 = scmp.lt.s32.totalorder %s419_s5, %s419_s5 }
 0x27a   :  { %p572_p7 = scmp.lt.s32.totalorder %s570_s8, %s566_s30 }
 0x27c   :  { %p573_p8 = por %p572_p7, %p571_p6 }
 0x27e   :  { %p574_p9 = pnand %p573_p8, %p567_p5 }
 0x280   :  { %577 = shalt.err (!%p574_p9)
}
 0x281   :  { %s597_s6 = smov 32   ;;  %s598_s9 = smov 2  }
 0x282   :  { %424 = dma.vmem_to_hbm [thread:$0]  %s419_s5, 32, %s691_s7, [#allocation4], %s597_s6, %s597_s6, %s598_s9  }
 0x283   :  { %588 = dma.done.wait [#allocation4], 128  }
 0x284   :  { %589 = vsyncadd [#allocation4], 4294967168 }
 0x285   :  { %428 = vsyncpa [#allocation3], 1 }
 0x286   :  { %429 = vsyncpa [#allocation4], 1 }

</bundles_post_ra>
